<compile_context>
chip_gen: v5e
topology: v5e:2x2
jax: 0.10.0
libtpu: 0.0.40
codegen_flags: <defaults>
</compile_context>

<pallas_src>
import functools

import jax
import jax.numpy as jnp
from jax.experimental import pallas as pl
from jax.experimental.pallas import tpu as pltpu

EPS = 1e-5  # PyTorch nn.LayerNorm default


# -------------------------- kernel --------------------------

def addnorm_kernel(x_ref, y_ref, g_ref, b_ref, o_ref, *, hidden):
    # z = X + Y in f32 for numerics.
    z = x_ref[...].astype(jnp.float32) + y_ref[...].astype(jnp.float32)

    # Single-pass statistics over the (real) hidden lanes.  Padded lanes are
    # zero in both X and Y, so they contribute nothing to either sum; we
    # divide by the real hidden count.
    inv_h = 1.0 / float(hidden)
    s = jnp.sum(z, axis=-1, keepdims=True)
    s2 = jnp.sum(z * z, axis=-1, keepdims=True)
    mean = s * inv_h
    var = s2 * inv_h - mean * mean

    inv = jax.lax.rsqrt(var + EPS)                 # EUP path
    out = (z - mean) * inv * g_ref[...] + b_ref[...]
    o_ref[...] = out.astype(o_ref.dtype)


# -------------------------- sizing helpers --------------------------

def _round_up(v, m):
    return ((v + m - 1) // m) * m


def _tpu_vmem_bytes():
    try:
        return int(pltpu.get_tpu_info().vmem_capacity_bytes)
    except Exception:
        # Conservative fallback (v7x has 64 MiB per TensorCore).
        return 64 * 1024 * 1024


def _vmem_limit_bytes():
    # Raise the scoped VMEM limit but stay well under physical capacity
    # (caps itself appropriately on v7x's 64 MiB vs v5e/v6e's 128 MiB).
    return int(min(96 * 1024 * 1024, _tpu_vmem_bytes() * 3 // 4))


def _pick_row_tile(rows, hidden_p, itemsize):
    """Largest multiple-of-8 row tile that fits the pipelined VMEM budget."""
    # Per grid step the pipeline holds 2 buffers x (X + Y + out) tiles in the
    # compute dtype, plus roughly 2 f32 tiles of in-register working set.
    budget = _vmem_limit_bytes() // 2          # headroom for scratch / vregs
    per_row = 2 * 3 * hidden_p * itemsize + 2 * hidden_p * 4
    tm = budget // max(per_row, 1)
    tm = max(8, min(1024, (tm // 8) * 8))

    rows8 = _round_up(rows, 8)
    # Keep >= 2 grid steps when there is enough work so the "parallel"
    # dimension can shard across v7x's two TensorCores.
    if rows8 >= 16:
        tm = min(tm, max(8, (rows8 // 2 // 8) * 8))
    tm = min(tm, rows8)
    return int(tm)


# -------------------------- wrapper --------------------------

def add_norm(x, y, gamma, beta):
    """LayerNorm(y + x) over the last axis.  x, y: (..., hidden)."""
    assert x.shape == y.shape
    hidden = x.shape[-1]
    assert gamma.shape == (hidden,) and beta.shape == (hidden,)

    orig_shape = x.shape
    rows = 1
    for d in orig_shape[:-1]:
        rows *= int(d)

    # Lane-dense output: pad hidden to a multiple of 128 (zeros).
    hidden_p = _round_up(hidden, 128)
    pad_h = hidden_p - hidden

    x2 = x.reshape(rows, hidden)
    y2 = y.reshape(rows, hidden)
    if pad_h:
        x2 = jnp.pad(x2, ((0, 0), (0, pad_h)))
        y2 = jnp.pad(y2, ((0, 0), (0, pad_h)))
        gamma_p = jnp.pad(gamma, (0, pad_h))
        beta_p = jnp.pad(beta, (0, pad_h))
    else:
        gamma_p, beta_p = gamma, beta

    # Pre-cast scale/shift to f32 once, outside the kernel.
    g2 = gamma_p.astype(jnp.float32).reshape(1, hidden_p)
    b2 = beta_p.astype(jnp.float32).reshape(1, hidden_p)

    itemsize = jnp.dtype(x.dtype).itemsize
    tm = _pick_row_tile(rows, hidden_p, itemsize)

    # Pad rows to a multiple of the tile (padded rows produce finite garbage
    # that is sliced off below; no risk of NaN since var=0 -> rsqrt(eps)).
    rows_p = _round_up(rows, tm)
    if rows_p != rows:
        x2 = jnp.pad(x2, ((0, rows_p - rows), (0, 0)))
        y2 = jnp.pad(y2, ((0, rows_p - rows), (0, 0)))

    grid = (rows_p // tm,)

    cost = pl.CostEstimate(
        flops=10 * rows * hidden,
        transcendentals=rows,
        bytes_accessed=3 * rows * hidden * itemsize,
    )

    kernel = functools.partial(addnorm_kernel, hidden=hidden)

    out = pl.pallas_call(
        kernel,
        out_shape=jax.ShapeDtypeStruct((rows_p, hidden_p), x.dtype),
        grid_spec=pltpu.PrefetchScalarGridSpec(
            num_scalar_prefetch=0,
            grid=grid,
            in_specs=[
                pl.BlockSpec((tm, hidden_p), lambda i: (i, 0)),   # X tile
                pl.BlockSpec((tm, hidden_p), lambda i: (i, 0)),   # Y tile
                pl.BlockSpec((1, hidden_p), lambda i: (0, 0)),    # gamma (f32)
                pl.BlockSpec((1, hidden_p), lambda i: (0, 0)),    # beta  (f32)
            ],
            out_specs=pl.BlockSpec((tm, hidden_p), lambda i: (i, 0)),
        ),
        compiler_params=pltpu.CompilerParams(
            dimension_semantics=("parallel",),
            vmem_limit_bytes=_vmem_limit_bytes(),
        ),
        cost_estimate=cost,
    )(x2, y2, g2, b2)

    out = out[:rows, :hidden]
    return out.reshape(orig_shape)


# -------------------------- demo / check --------------------------

if __name__ == "__main__":
    key = jax.random.PRNGKey(0)
    kx, ky = jax.random.split(key)

    batch, seq, hidden = 2, 8, 32
    x = jax.random.normal(kx, (batch, seq, hidden), dtype=jnp.float32)
    y = jax.random.normal(ky, (batch, seq, hidden), dtype=jnp.float32)

    # nn.LayerNorm(normalized_shape=hidden) default init: weight=1, bias=0
    gamma = jnp.ones((hidden,), dtype=jnp.float32)
    beta = jnp.zeros((hidden,), dtype=jnp.float32)

    out = add_norm(x, y, gamma, beta)
    out = jax.block_until_ready(out)

    # Reference check in plain JAX (matches PyTorch LayerNorm semantics).
    z = x + y
    mean = jnp.mean(z, axis=-1, keepdims=True)
    var = jnp.mean((z - mean) ** 2, axis=-1, keepdims=True)
    ref = (z - mean) / jnp.sqrt(var + EPS) * gamma + beta
    assert jnp.allclose(out, ref, atol=1e-4, rtol=1e-4), "mismatch vs reference"

    print("KERNEL_OK")
</pallas_src>

<mosaic_0001>
module attributes {stable_mosaic.version = 11 : i64} {
  func.func @addnorm_kernel(%arg0: i32, %arg1: memref<8x128xf32, #tpu.memory_space<vmem>>, %arg2: memref<8x128xf32, #tpu.memory_space<vmem>>, %arg3: memref<1x128xf32, #tpu.memory_space<vmem>>, %arg4: memref<1x128xf32, #tpu.memory_space<vmem>>, %arg5: memref<8x128xf32, #tpu.memory_space<vmem>>) attributes {dimension_semantics = [#tpu.dimension_semantics<parallel>], iteration_bounds = array<i64: 2>, scalar_prefetch = 0 : i64, scratch_operands = 0 : i64, tpu.core_type = #tpu.core_type<tc>, window_params = [{transform_indices = @transform_0, window_bounds = array<i64: 8, 128>}, {transform_indices = @transform_1, window_bounds = array<i64: 8, 128>}, {pipeline_mode = #tpu.pipeline_mode<synchronous>, transform_indices = @transform_2, window_bounds = array<i64: 1, 128>}, {pipeline_mode = #tpu.pipeline_mode<synchronous>, transform_indices = @transform_3, window_bounds = array<i64: 1, 128>}, {transform_indices = @transform_4, window_bounds = array<i64: 8, 128>}]} {
    %c0 = arith.constant 0 : index
    %c0_0 = arith.constant 0 : index
    %0 = vector.load %arg1[%c0, %c0_0] : memref<8x128xf32, #tpu.memory_space<vmem>>, vector<8x128xf32>
    %c0_1 = arith.constant 0 : index
    %c0_2 = arith.constant 0 : index
    %1 = vector.load %arg2[%c0_1, %c0_2] : memref<8x128xf32, #tpu.memory_space<vmem>>, vector<8x128xf32>
    %2 = arith.addf %0, %1 : vector<8x128xf32>
    %cst = arith.constant dense<0.000000e+00> : vector<8xf32>
    %3 = vector.multi_reduction <add>, %2, %cst [1] : vector<8x128xf32> to vector<8xf32>
    %4 = vector.shape_cast %3 : vector<8xf32> to vector<8x1xf32>
    %5 = arith.mulf %2, %2 : vector<8x128xf32>
    %cst_3 = arith.constant dense<0.000000e+00> : vector<8xf32>
    %6 = vector.multi_reduction <add>, %5, %cst_3 [1] : vector<8x128xf32> to vector<8xf32>
    %7 = vector.shape_cast %6 : vector<8xf32> to vector<8x1xf32>
    %cst_4 = arith.constant 3.125000e-02 : f32
    %8 = vector.broadcast %cst_4 : f32 to vector<8x1xf32>
    %9 = arith.mulf %4, %8 : vector<8x1xf32>
    %cst_5 = arith.constant 3.125000e-02 : f32
    %10 = vector.broadcast %cst_5 : f32 to vector<8x1xf32>
    %11 = arith.mulf %7, %10 : vector<8x1xf32>
    %12 = arith.mulf %9, %9 : vector<8x1xf32>
    %13 = arith.subf %11, %12 : vector<8x1xf32>
    %cst_6 = arith.constant 9.99999974E-6 : f32
    %14 = vector.broadcast %cst_6 : f32 to vector<8x1xf32>
    %15 = arith.addf %13, %14 : vector<8x1xf32>
    %16 = math.rsqrt %15 : vector<8x1xf32>
    %17 = vector.broadcast %9 : vector<8x1xf32> to vector<8x128xf32>
    %18 = arith.subf %2, %17 : vector<8x128xf32>
    %19 = vector.broadcast %16 : vector<8x1xf32> to vector<8x128xf32>
    %20 = arith.mulf %18, %19 : vector<8x128xf32>
    %c0_7 = arith.constant 0 : index
    %c0_8 = arith.constant 0 : index
    %21 = vector.load %arg3[%c0_7, %c0_8] : memref<1x128xf32, #tpu.memory_space<vmem>>, vector<1x128xf32>
    %22 = vector.broadcast %21 : vector<1x128xf32> to vector<8x128xf32>
    %23 = arith.mulf %20, %22 : vector<8x128xf32>
    %c0_9 = arith.constant 0 : index
    %c0_10 = arith.constant 0 : index
    %24 = vector.load %arg4[%c0_9, %c0_10] : memref<1x128xf32, #tpu.memory_space<vmem>>, vector<1x128xf32>
    %25 = vector.broadcast %24 : vector<1x128xf32> to vector<8x128xf32>
    %26 = arith.addf %23, %25 : vector<8x128xf32>
    %c0_11 = arith.constant 0 : index
    %c0_12 = arith.constant 0 : index
    %27 = vector.load %arg5[%c0_11, %c0_12] : memref<8x128xf32, #tpu.memory_space<vmem>>, vector<8x128xf32>
    tpu.vector_store %arg5[%c0_11, %c0_12], %26 {strides = array<i32>} : memref<8x128xf32, #tpu.memory_space<vmem>>, vector<8x128xf32>,
    return
  }
  func.func @transform_0(%arg0: i32) -> (i32, i32) {
    %c0_i32 = arith.constant 0 : i32
    %c0_i32_0 = arith.constant 0 : i32
    return %arg0, %c0_i32 : i32, i32
  }
  func.func @transform_1(%arg0: i32) -> (i32, i32) {
    %c0_i32 = arith.constant 0 : i32
    %c0_i32_0 = arith.constant 0 : i32
    return %arg0, %c0_i32 : i32, i32
  }
  func.func @transform_2(%arg0: i32) -> (i32, i32) {
    %c0_i32 = arith.constant 0 : i32
    %c0_i32_0 = arith.constant 0 : i32
    %c0_i32_1 = arith.constant 0 : i32
    return %c0_i32, %c0_i32_0 : i32, i32
  }
  func.func @transform_3(%arg0: i32) -> (i32, i32) {
    %c0_i32 = arith.constant 0 : i32
    %c0_i32_0 = arith.constant 0 : i32
    %c0_i32_1 = arith.constant 0 : i32
    return %c0_i32, %c0_i32_0 : i32, i32
  }
  func.func @transform_4(%arg0: i32) -> (i32, i32) {
    %c0_i32 = arith.constant 0 : i32
    %c0_i32_0 = arith.constant 0 : i32
    return %arg0, %c0_i32 : i32, i32
  }
}

</mosaic_0001>

<bundles_post_ra>
// kernel: tpu_custom_call.1
= control target key start
LH: loop header
LB: loop body
LE: loop exit
PB: predicated region body
PF: predicated region fallthrough
CT: control target
= control target key end

     0   :  { %s797_s0 = inlined_call_operand.hbm [shape: f32[16,128], index: 0, kind: input, shape index: {}]   ;;  %s798_s1 = inlined_call_operand.hbm [shape: f32[16,128], index: 1, kind: input, shape index: {}]   ;;  %s799_s2 = inlined_call_operand.vmem [shape: f32[1,128], index: 2, kind: input, shape index: {}]   ;;  %s800_s3 = inlined_call_operand.vmem [shape: f32[1,128], index: 3, kind: input, shape index: {}]   ;;  %s801_s4 = inlined_call_operand.hbm [shape: f32[16,128], index: 4, kind: output, shape index: {}]  }
   0x1   :  { %802 = sst [smem:[#allocation11_spill]] %s797_s0 }
   0x2   :  { %9 = vsyncpa [#allocation3], 0 }
   0x3   :  { %11 = vsyncpa [#allocation3 + $0x1], 0 }
   0x4   :  { %12 = vsyncpa [#allocation6], 0 }
   0x5   :  { %14 = vsyncpa [#allocation6 + $0x1], 0 }
   0x6   :  { %15 = vsyncpa [#allocation4], 0 }
   0x7   :  { %17 = vsyncpa [#allocation4 + $0x1], 0  ;;  %s626_s15 = smov 0   ;;  %s628_s16 = smov 0  }
   0x8   :  { %s630_s17 = smov 0   ;;  %s632_s18 = smov 0  }
   0x9 LB: > { %s647_s19 = sadd.s32 4294967295, %s599_s18   ;;  %s399_s20 = sadd.s32 4294967294, %s599_s18   ;;  %s599_s18 = sphi %s632_s18, %s814_s18   ;;  %s595_s17 = sphi %s630_s17, %s813_s17   ;;  %s591_s16 = sphi %s628_s16, %s812_s16   ;;  %s587_s15 = sphi %s626_s15, %s811_s15  }
   0xa   : > { %s651_s21 = sadd.s32 1, %s599_s18   ;;  %s30_s22 = sadd.s32 1, %s595_s17 }
   0xb   : > { %s27_s23 = ssub.s32 %s599_s18, %s651_s21  ;;  %p37_p0 = scmp.ne.s32.totalorder %s595_s17, %s591_s16 }
   0xc   : > { %p28_p1 = scmp.eq.s32.totalorder %s27_s23, 0  ;;  %p38_p2 = scmp.eq.s32.totalorder %s599_s18, 0 }
   0xd   : > { %p43_p3 = scmp.ne.s32.totalorder %s591_s16, %s587_s15  ;;  %p44_p4 = scmp.eq.s32.totalorder %s647_s19, 0 }
   0xe   : > { %s663_s24 = scalar_select %p28_p1, %s595_s17, %s30_s22  }
   0xf   : > { %p665_p5 = por %p38_p2, %p37_p0  ;;  %p669_p6 = por %p44_p4, %p43_p3 }
  0x10   : > { %p135_p7 = scmp.eq.s32.totalorder %s647_s19, 1  ;;  %p141_p8 = scmp.eq.s32.totalorder %s399_s20, 1 }
  0x11   : > { %p431_p10 = scmp.lt.s32.totalorder %s599_s18, 2  ;;  %s685_s29 = sand.u32 1, %s595_s17  }
  0x12   : > { %p676_p11 = por %p135_p7, %p37_p0  ;;  %p680_p12 = por %p141_p8, %p43_p3 }
  0x13   : > { %s403_s30 = sshll.u32 %s599_s18, 3  ;;  %s402_s5 = sshll.u32 %s685_s29, 3 }
  0x14   : > { %s807_s0 = sld [smem:[#allocation11_spill]]  ;;  %s171_s10 = scalar_lea.vmem [#allocation2], %s402_s5 }
  0x15   : > { %s179_s11 = sshll.u32 %s171_s10, 4  ;;  %p694_p13 = pnand %p431_p10, %p665_p5  ;;  %s180_s11 = int_to_ptr.vmem [resolvable:$true] %s179_s11 }
  0x16   : > { %p406_p0 = scmp.ge.s32.totalorder %s599_s18, 1  ;;  %p203_p1 = scmp.lt.s32.totalorder %s599_s18, 3 }
  0x17   : > { %s168_s13 = scalar_lea.sflag [#allocation3], %s685_s29  ;;  %p473_p3 = pneg %p694_p13 }
  0x1a   : > { %s175_s8 = scalar_lea.hbm %s807_s0, %s403_s30  ;;  %s476_s25 = scalar_lea.hbm %s807_s0, 16 }
  0x1b   : > { %s177_s9 = sshll.u32 %s175_s8, 4  ;;  %s178_s9 = int_to_ptr.hbm [resolvable:$true] %s177_s9 }
  0x1c   : > { %s469_s14 = sshra.s32 %s178_s9, 4  ;;  %s470_s14 = int_to_ptr.hbm [resolvable:$true] %s469_s14 }
  0x1d   : > { %s471_s20 = scalar_lea.hbm %s470_s14, 8  ;;  %p477_p5 = scmp.lt.s32.totalorder %s470_s14, %s807_s0 }
  0x1e   : > { %p472_p2 = scmp.ne.s32.totalorder %s470_s14, %s471_s20  ;;  %p478_p8 = scmp.lt.s32.totalorder %s476_s25, %s471_s20 }
  0x20   : > { %p474_p4 = pnand %p473_p3, %p472_p2  ;;  %p479_p10 = por %p478_p8, %p477_p5 }
  0x22   : > { %p475_p7 = pneg %p474_p4 }
  0x24   : > { %p480_p9 = pnand %p479_p10, %p475_p7 }
  0x26   : > { %483 = shalt.err (!%p480_p9)
}
  0x27   : > { %423 = dma.hbm_to_vmem [thread:$0]  (!%p694_p13), %s178_s9, 128, %s180_s11, %s168_s13  }
  0x28   : > { %p718_p2 = pnand %p406_p0, %p203_p1  ;;  %s194_s14 = scalar_lea.hbm %s798_s1, %s403_s30 }
  0x29   : > { %s196_s20 = sshll.u32 %s194_s14, 4  ;;  %s190_s23 = scalar_lea.vmem [#allocation5], %s402_s5  ;;  %s197_s20 = int_to_ptr.hbm [resolvable:$true] %s196_s20 }
  0x2a   : > { %s198_s25 = sshll.u32 %s190_s23, 4  ;;  %s187_s6 = scalar_lea.sflag [#allocation6], %s685_s29  ;;  %s199_s25 = int_to_ptr.vmem [resolvable:$true] %s198_s25 }
  0x2b   : > { %s499_s7 = sshra.s32 %s197_s20, 4  ;;  %s506_s13 = scalar_lea.hbm %s798_s1, 16  ;;  %s500_s7 = int_to_ptr.hbm [resolvable:$true] %s499_s7 }
  0x2c   : > { %s501_s0 = scalar_lea.hbm %s500_s7, 8  ;;  %p507_p4 = scmp.lt.s32.totalorder %s500_s7, %s798_s1 }
  0x2d   : > { %p502_p9 = scmp.ne.s32.totalorder %s500_s7, %s501_s0  ;;  %p508_p7 = scmp.lt.s32.totalorder %s506_s13, %s501_s0 }
  0x2f   : > { %p504_p0 = pnand %p502_p9, %p473_p3  ;;  %p509_p5 = por %p508_p7, %p507_p4 }
  0x31   : > { %p505_p1 = pneg %p504_p0 }
  0x33   : > { %p510_p8 = pnand %p509_p5, %p505_p1 }
  0x35   : > { %513 = shalt.err (!%p510_p8)
}
  0x36   : > { %426 = dma.hbm_to_vmem [thread:$0]  (!%p694_p13), %s197_s20, 128, %s199_s25, %s187_s6  }
  0x37   : > { %207 = sbr.rel (%p718_p2) target bundleno = 223 (0xdf), region = 36  ;;  %s740_s29 = sand.u32 (!%p718_p2), 1, %s591_s16  }
  0x38   : > { %s743_s5 = sshll.u32 (!%p718_p2), %s740_s29, 3  ;;  %s210_s22 = scalar_lea.sflag (!%p718_p2), [#allocation3], %s740_s29 }
  0x39   : > { %s213_s0 = scalar_lea.vmem (!%p718_p2), [#allocation2], %s743_s5 }
  0x3c   : > { %574 = dma.done.wait (%p669_p6), %s210_s22, 128  }
  0x3d   : > { %576 = vsyncadd (%p669_p6), %s210_s22, 4294967168  ;;  %s220_s12 = scalar_lea.sflag [#allocation6], %s740_s29  ;;  %s223_s8 = scalar_lea.vmem [#allocation5], %s743_s5 }
  0x3e   : > { %578 = dma.done.wait (%p669_p6), %s220_s12, 128  }
  0x3f   : > { %580 = vsyncadd (%p669_p6), %s220_s12, 4294967168  ;;  %v254_v0 = vld [vmem:[%s213_s0] sm:$0xff]  ;;  %v255_v1 = vld [vmem:[%s223_s8] sm:$0xff]  ;;  %s411_s26 = sshll.u32 %s647_s19, 3  ;;  %s253_s19 = scalar_lea.vmem [#allocation7], %s743_s5 }
  0x40   : > { %v256_v2 = vadd.f32 %v255_v1, %v254_v0  ;;  %v465_v18 = vld [vmem:[%s799_s2] ss:$0 sm:$0xff]  ;;  %s301_s6 = scalar_lea.hbm %s801_s4, %s411_s26  ;;  %s303_s11 = sshll.u32 %s253_s19, 4  ;;  %s304_s11 = int_to_ptr.vmem [resolvable:$true] %s303_s11 }
  0x41   : > { %v466_v21 = vld [vmem:[%s800_s3] ss:$0 sm:$0xff]  ;;  %s305_s13 = sshll.u32 %s301_s6, 4  ;;  %s291_s10 = scalar_lea.sflag [#allocation4], %s740_s29  ;;  %s306_s13 = int_to_ptr.hbm [resolvable:$true] %s305_s13 }
  0x42   : > { %257 = vadd.xlane.f32.xlu0 %v256_v2  ;;  %v259_v3 = vmul.f32 %v256_v2, %v256_v2  ;;  %s543_s30 = sshra.s32 %s306_s13, 4  ;;  %s549_s8 = scalar_lea.hbm %s801_s4, 16  ;;  %s544_s30 = int_to_ptr.hbm [resolvable:$true] %s543_s30 }
  0x43   : > { %s545_s22 = scalar_lea.hbm %s544_s30, 8  ;;  %p550_p10 = scmp.lt.s32.totalorder %s544_s30, %s801_s4 }
  0x44   : > { %p546_p6 = scmp.ne.s32.totalorder %s544_s30, %s545_s22  ;;  %p551_p2 = scmp.lt.s32.totalorder %s549_s8, %s545_s22 }
  0x46   : > { %p547_p13 = pnand %p546_p6, %p676_p11  ;;  %p552_p9 = por %p551_p2, %p550_p10 }
  0x48   : > { %p548_p3 = pneg %p547_p13 }
  0x4a   : > { %260 = vadd.xlane.f32.xlu0 %v259_v3  ;;  %p553_p0 = pnand %p552_p9, %p548_p3 }
  0xb5   : > { %v258_v4 = vpop.xlane.xlu0 %257 }
  0xb6   : > { %v262_v5 = vmul.f32 0.03125, %v258_v4 }
  0xb8   : > { %v264_v7 = vmul.f32 %v262_v5, %v262_v5  ;;  %v277_v17 = vsub.f32 %v256_v2, %v262_v5 }
  0xbd   : > { %v261_v6 = vpop.xlane.xlu0 %260 }
  0xbe   : > { %v263_v8 = vmul.f32 0.03125, %v261_v6 }
  0xc0   : > { %v265_v9 = vsub.f32 %v263_v8, %v264_v7 }
  0xc2   : > { %v266_v10 = vadd.f32 1e-05, %v265_v9 }
  0xc4   : > { %467 = vrsqrt.f32 %v266_v10  ;;  %vm273_vm1 = vweird.f32 %v266_v10 }
  0xca   : > { %v468_v11 = vpop.eup %467 }
  0xcb   : > { %v268_v12 = vmul.f32 %v468_v11, %v266_v10  ;;  %vm274_vm0 = vweird.f32 %v468_v11 }
  0xcc   : > { %vm275_vm2 = vmor %vm273_vm1, %vm274_vm0 }
  0xcd   : > { %v269_v13 = vmul.f32 %v468_v11, %v268_v12 }
  0xcf   : > { %v270_v14 = vmul.f32 0.5, %v269_v13 }
  0xd1   : > { %v271_v15 = vsub.f32 1.5, %v270_v14 }
  0xd3   : > { %v272_v16 = vmul.f32 %v468_v11, %v271_v15 }
  0xd5   : > { %v276_v19 = vsel %vm275_vm2, %v468_v11, %v272_v16 }
  0xd6   : > { %v278_v20 = vmul.f32 %v277_v17, %v276_v19 }
  0xd8   : > { %v283_v22 = vmul.f32 %v465_v18, %v278_v20 }
  0xda   : > { %v288_v23 = vadd.f32 %v466_v21, %v283_v22 }
  0xdc   : > { %289 = vst [vmem:[%s253_s19] sm:$0xff] %v288_v23 }
  0xdd   : > { %556 = shalt.err (!%p553_p0)
}
  0xde   : > { %418 = dma.vmem_to_hbm [thread:$0]  (%p676_p11), %s304_s11, 128, %s306_s13, %s291_s10  }
  0xdf PF: > { %s317_s29 = sand.u32 1, %s587_s15   ;;  %p810_p1 = scmp.ge.s32.totalorder %s599_s18, 2 }
  0xe0   : > { %s318_s14 = scalar_lea.sflag [#allocation4], %s317_s29 }
  0xe1   : > { %p428_p4 = pnand %p810_p1, %p680_p12 }
  0xe3   : > { %p429_p7 = pneg %p428_p4 }
  0xe5   : > { %582 = dma.done.wait (%p429_p7), %s318_s14, 128  }
  0xe6   : > { %584 = vsyncadd (%p429_p7), %s318_s14, 4294967168  ;;  %p20_p5 = scmp.ge.s32.totalorder %s651_s21, 4   ;;  %s811_s15 = smov %s591_s16 }
  0xe7   : > { %s812_s16 = smov %s595_s17  ;;  %s813_s17 = smov %s663_s24 }
  0xe8   : > { %s814_s18 = smov %s651_s21  ;;  %22 = sbr.rel (!%p20_p5) target bundleno = 9 (0x9), region = 94 }
  0xed   :  { %324 = vsyncpa [#allocation3], 1 }
  0xee   :  { %326 = vsyncpa [#allocation3 + $0x1], 1 }
  0xef   :  { %327 = vsyncpa [#allocation6], 1 }
  0xf0   :  { %329 = vsyncpa [#allocation6 + $0x1], 1 }
  0xf1   :  { %330 = vsyncpa [#allocation4], 1 }
  0xf2   :  { %332 = vsyncpa [#allocation4 + $0x1], 1 }

</bundles_post_ra>
